<compile_context>
chip_gen: v5e
topology: v5e:2x2
jax: 0.10.0
libtpu: 0.0.40
codegen_flags: <defaults>
</compile_context>

<pallas_src>
import functools

import jax
import jax.numpy as jnp
import numpy as np
from jax.experimental import pallas as pl
from jax.experimental.pallas import tpu as pltpu

MIN_F32 = float(np.finfo(np.float32).min)


def _round_up(x, m):
    return (x + m - 1) // m * m


def _pad_axis(x, target, axis, value=0):
    pad = target - x.shape[axis]
    if pad <= 0:
        return x
    widths = [(0, 0)] * x.ndim
    widths[axis] = (0, pad)
    return jnp.pad(x, widths, constant_values=value)


def _dense_synth_kernel(q_ref, v_ref, m_ref,
                        w1t_ref, b1_ref, w2t_ref, b2_ref,
                        wvt_ref, bv_ref, wot_ref, bo_ref,
                        out_ref, *, n_head):
    q = q_ref[...].astype(jnp.float32)            # (Tt, Fp)
    val = v_ref[...].astype(jnp.float32)          # (T2, Fp)
    keep = m_ref[...] != 0                        # (Tt, T2) bool
    keep_f = keep.astype(jnp.float32)
    neg_bias = (1.0 - keep_f) * MIN_F32           # additive mask bias, once

    # linear1 + relu  (weights pre-transposed: y = x @ W^T)
    h1 = jnp.maximum(
        jnp.dot(q, w1t_ref[...], preferred_element_type=jnp.float32) + b1_ref[...],
        0.0)                                      # (Tt, Fp)

    acc = jnp.zeros(out_ref.shape, jnp.float32)   # (Tt, Fp) output accumulator
    for h in range(n_head):                       # static unroll; H is small
        # dense synthesized logits for this head: (Tt, T2)
        s = jnp.dot(h1, w2t_ref[h], preferred_element_type=jnp.float32) + b2_ref[h]
        s = s + neg_bias
        s = s - jnp.max(s, axis=-1, keepdims=True)
        e = jnp.exp(s)
        attn = e * pl.reciprocal(jnp.sum(e, axis=-1, keepdims=True), approx=True)
        attn = attn * keep_f                      # == masked_fill(mask, 0.0)
        # per-head value projection (T2, d_k) and context (Tt, d_k)
        vh = jnp.dot(val, wvt_ref[h], preferred_element_type=jnp.float32) + bv_ref[h]
        ctx = jnp.dot(attn, vh, preferred_element_type=jnp.float32)
        # accumulate the output projection instead of concatenating head tiles
        acc = acc + jnp.dot(ctx, wot_ref[h], preferred_element_type=jnp.float32)

    out_ref[...] = (acc + bo_ref[...]).astype(out_ref.dtype)


def dense_synthesizer_attention(query, value, mask, params, *, n_head, time2,
                                tile_t1=256):
    """query: (B, T1, F), value: (B, T2, F), mask: (B, T1, T2) -> (B, T1, F)."""
    batch, t1, n_feat = query.shape
    _, t2, _ = value.shape
    assert t2 == time2
    assert n_feat % n_head == 0
    d_k = n_feat // n_head

    w1, b1, w2, b2, wv, bv, wo, bo = params

    f_p = _round_up(n_feat, 128)                  # lane-dense feature dim
    tile_t1 = min(tile_t1, _round_up(t1, 8))
    t1_p = _round_up(t1, tile_t1)

    # ---- inputs: pad feature dim to 128 lanes, pad T1 to a tile multiple ----
    q_p = _pad_axis(_pad_axis(query, f_p, 2), t1_p, 1)
    v_p = _pad_axis(value, f_p, 2)
    m_p = _pad_axis(mask, t1_p, 1, value=1).astype(jnp.int8)   # small mask DMA

    # ---- weights: pre-transpose once, split per head with a leading H axis ----
    w1t = _pad_axis(_pad_axis(w1, f_p, 0), f_p, 1).T                      # (Fp, Fp)
    b1p = _pad_axis(b1, f_p, 0).reshape(1, f_p)
    w2t = jnp.transpose(_pad_axis(w2.reshape(n_head, time2, n_feat), f_p, 2),
                        (0, 2, 1))                                        # (H, Fp, T2)
    b2p = b2.reshape(n_head, 1, time2)
    wvt = jnp.transpose(_pad_axis(wv.reshape(n_head, d_k, n_feat), f_p, 2),
                        (0, 2, 1))                                        # (H, Fp, d_k)
    bvp = bv.reshape(n_head, 1, d_k)
    wot = _pad_axis(wo.T.reshape(n_head, d_k, n_feat), f_p, 2)            # (H, d_k, Fp)
    bop = _pad_axis(bo, f_p, 0).reshape(1, f_p)

    kernel = functools.partial(_dense_synth_kernel, n_head=n_head)

    def const_spec(arr):
        n = arr.ndim
        return pl.BlockSpec(arr.shape, lambda b, i: (0,) * n)

    out = pl.pallas_call(
        kernel,
        out_shape=jax.ShapeDtypeStruct((batch, t1_p, f_p), query.dtype),
        grid=(batch, t1_p // tile_t1),
        in_specs=[
            pl.BlockSpec((None, tile_t1, f_p), lambda b, i: (b, i, 0)),   # query tile
            pl.BlockSpec((None, t2, f_p),      lambda b, i: (b, 0, 0)),   # value
            pl.BlockSpec((None, tile_t1, t2),  lambda b, i: (b, i, 0)),   # mask tile
            const_spec(w1t), const_spec(b1p),
            const_spec(w2t), const_spec(b2p),
            const_spec(wvt), const_spec(bvp),
            const_spec(wot), const_spec(bop),
        ],
        out_specs=pl.BlockSpec((None, tile_t1, f_p), lambda b, i: (b, i, 0)),
        compiler_params=pltpu.CompilerParams(
            dimension_semantics=("parallel", "parallel"),
            vmem_limit_bytes=48 * 1024 * 1024),
    )(q_p, v_p, m_p, w1t, b1p, w2t, b2p, wvt, bvp, wot, bop)

    return out[:, :t1, :n_feat]


def _init_linear(key, out_dim, in_dim):
    """Deterministic PyTorch-like (kaiming-uniform-ish) init."""
    kw, kb = jax.random.split(key)
    bound = 1.0 / np.sqrt(in_dim)
    w = jax.random.uniform(kw, (out_dim, in_dim), jnp.float32, -bound, bound)
    b = jax.random.uniform(kb, (out_dim,), jnp.float32, -bound, bound)
    return w, b


def _reference(query, value, mask, params, *, n_head, time2):
    """Pure-JAX replica of the PyTorch forward (eval mode)."""
    w1, b1, w2, b2, wv, bv, wo, bo = params
    n_batch, t1, n_feat = query.shape
    d_k = n_feat // n_head
    h1 = jnp.maximum(query @ w1.T + b1, 0.0)
    B = (h1 @ w2.T + b2).reshape(n_batch, t1, n_head, time2).transpose(0, 2, 1, 3)
    v = (value @ wv.T + bv).reshape(n_batch, time2, n_head, d_k).transpose(0, 2, 1, 3)
    m = (mask[:, None, :, :] == 0)
    B = jnp.where(m, MIN_F32, B)
    attn = jax.nn.softmax(B, axis=-1)
    attn = jnp.where(m, 0.0, attn)
    x = jnp.einsum("bhqt,bhtd->bhqd", attn, v)
    x = x.transpose(0, 2, 1, 3).reshape(n_batch, t1, n_head * d_k)
    return x @ wo.T + bo


if __name__ == "__main__":
    n_head, n_feat, time1, time2, batch = 2, 32, 8, 8, 2

    key = jax.random.PRNGKey(0)
    k_q, k_v, k_m, k1, k2, k3, k4 = jax.random.split(key, 7)

    query = jax.random.normal(k_q, (batch, time1, n_feat), jnp.float32)
    value = jax.random.normal(k_v, (batch, time2, n_feat), jnp.float32)
    # mask: 1 == keep, 0 == masked; keep at least column 0.
    mask = (jax.random.uniform(k_m, (batch, time1, time2)) > 0.2).astype(jnp.int32)
    mask = mask.at[:, :, 0].set(1)

    w1, b1 = _init_linear(k1, n_feat, n_feat)
    w2, b2 = _init_linear(k2, n_head * time2, n_feat)
    wv, bv = _init_linear(k3, n_feat, n_feat)
    wo, bo = _init_linear(k4, n_feat, n_feat)
    params = (w1, b1, w2, b2, wv, bv, wo, bo)

    out = dense_synthesizer_attention(query, value, mask, params,
                                      n_head=n_head, time2=time2)
    out = jax.block_until_ready(out)

    ref = _reference(query, value, mask, params, n_head=n_head, time2=time2)
    # approx reciprocal in the kernel softmax -> slightly loosened tolerance.
    np.testing.assert_allclose(np.asarray(out), np.asarray(ref),
                               rtol=5e-3, atol=5e-3)

    print("KERNEL_OK")
</pallas_src>

<mosaic_0001>
module attributes {stable_mosaic.version = 11 : i64} {
  func.func @_dense_synth_kernel(%arg0: i32, %arg1: i32, %arg2: memref<1x8x128xf32, #tpu.memory_space<vmem>>, %arg3: memref<1x8x128xf32, #tpu.memory_space<vmem>>, %arg4: memref<1x8x8xi8, #tpu.memory_space<vmem>>, %arg5: memref<128x128xf32, #tpu.memory_space<vmem>>, %arg6: memref<1x128xf32, #tpu.memory_space<vmem>>, %arg7: memref<2x128x8xf32, #tpu.memory_space<vmem>>, %arg8: memref<2x1x8xf32, #tpu.memory_space<vmem>>, %arg9: memref<2x128x16xf32, #tpu.memory_space<vmem>>, %arg10: memref<2x1x16xf32, #tpu.memory_space<vmem>>, %arg11: memref<2x16x128xf32, #tpu.memory_space<vmem>>, %arg12: memref<1x128xf32, #tpu.memory_space<vmem>>, %arg13: memref<1x8x128xf32, #tpu.memory_space<vmem>>) attributes {dimension_semantics = [#tpu.dimension_semantics<parallel>, #tpu.dimension_semantics<parallel>], iteration_bounds = array<i64: 2, 1>, scalar_prefetch = 0 : i64, scratch_operands = 0 : i64, tpu.core_type = #tpu.core_type<tc>, window_params = [{transform_indices = @transform_0, window_bounds = array<i64: 1, 8, 128>}, {transform_indices = @transform_1, window_bounds = array<i64: 1, 8, 128>}, {transform_indices = @transform_2, window_bounds = array<i64: 1, 8, 8>}, {pipeline_mode = #tpu.pipeline_mode<synchronous>, transform_indices = @transform_3, window_bounds = array<i64: 128, 128>}, {pipeline_mode = #tpu.pipeline_mode<synchronous>, transform_indices = @transform_4, window_bounds = array<i64: 1, 128>}, {pipeline_mode = #tpu.pipeline_mode<synchronous>, transform_indices = @transform_5, window_bounds = array<i64: 2, 128, 8>}, {pipeline_mode = #tpu.pipeline_mode<synchronous>, transform_indices = @transform_6, window_bounds = array<i64: 2, 1, 8>}, {pipeline_mode = #tpu.pipeline_mode<synchronous>, transform_indices = @transform_7, window_bounds = array<i64: 2, 128, 16>}, {pipeline_mode = #tpu.pipeline_mode<synchronous>, transform_indices = @transform_8, window_bounds = array<i64: 2, 1, 16>}, {pipeline_mode = #tpu.pipeline_mode<synchronous>, transform_indices = @transform_9, window_bounds = array<i64: 2, 16, 128>}, {pipeline_mode = #tpu.pipeline_mode<synchronous>, transform_indices = @transform_10, window_bounds = array<i64: 1, 128>}, {transform_indices = @transform_11, window_bounds = array<i64: 1, 8, 128>}]} {
    %c0 = arith.constant 0 : index
    %c0_0 = arith.constant 0 : index
    %c0_1 = arith.constant 0 : index
    %0 = vector.load %arg2[%c0, %c0_0, %c0_1] : memref<1x8x128xf32, #tpu.memory_space<vmem>>, vector<1x8x128xf32>
    %1 = vector.shape_cast %0 : vector<1x8x128xf32> to vector<8x128xf32>
    %c0_2 = arith.constant 0 : index
    %c0_3 = arith.constant 0 : index
    %c0_4 = arith.constant 0 : index
    %2 = vector.load %arg3[%c0_2, %c0_3, %c0_4] : memref<1x8x128xf32, #tpu.memory_space<vmem>>, vector<1x8x128xf32>
    %3 = vector.shape_cast %2 : vector<1x8x128xf32> to vector<8x128xf32>
    %c0_5 = arith.constant 0 : index
    %c0_6 = arith.constant 0 : index
    %c0_7 = arith.constant 0 : index
    %4 = vector.load %arg4[%c0_5, %c0_6, %c0_7] : memref<1x8x8xi8, #tpu.memory_space<vmem>>, vector<1x8x8xi8>
    %5 = vector.shape_cast %4 : vector<1x8x8xi8> to vector<8x8xi8>
    %c0_i8 = arith.constant 0 : i8
    %6 = vector.broadcast %c0_i8 : i8 to vector<8x8xi8>
    %7 = arith.cmpi ne, %5, %6 : vector<8x8xi8>
    %8 = arith.extui %7 : vector<8x8xi1> to vector<8x8xi32>
    %9 = arith.sitofp %8 : vector<8x8xi32> to vector<8x8xf32>
    %cst = arith.constant 1.000000e+00 : f32
    %10 = vector.broadcast %cst : f32 to vector<8x8xf32>
    %11 = arith.subf %10, %9 : vector<8x8xf32>
    %cst_8 = arith.constant -3.40282347E+38 : f32
    %12 = vector.broadcast %cst_8 : f32 to vector<8x8xf32>
    %13 = arith.mulf %11, %12 : vector<8x8xf32>
    %c0_9 = arith.constant 0 : index
    %c0_10 = arith.constant 0 : index
    %14 = vector.load %arg5[%c0_9, %c0_10] : memref<128x128xf32, #tpu.memory_space<vmem>>, vector<128x128xf32>
    %cst_11 = arith.constant dense<0.000000e+00> : vector<8x128xf32>
    %15 = tpu.matmul %1, %14, %cst_11 {dimension_numbers = #tpu.dot_dimension_numbers<[1], [0], [0], [1], [0, 0, 1, 1], [], []>} : vector<8x128xf32>, vector<128x128xf32>, vector<8x128xf32> -> vector<8x128xf32>
    %c0_12 = arith.constant 0 : index
    %c0_13 = arith.constant 0 : index
    %16 = vector.load %arg6[%c0_12, %c0_13] : memref<1x128xf32, #tpu.memory_space<vmem>>, vector<1x128xf32>
    %17 = vector.broadcast %16 : vector<1x128xf32> to vector<8x128xf32>
    %18 = arith.addf %15, %17 : vector<8x128xf32>
    %cst_14 = arith.constant 0.000000e+00 : f32
    %19 = vector.broadcast %cst_14 : f32 to vector<8x128xf32>
    %20 = arith.maximumf %18, %19 : vector<8x128xf32>
    %cst_15 = arith.constant 0.000000e+00 : f32
    %21 = vector.broadcast %cst_15 : f32 to vector<8x128xf32>
    %c0_16 = arith.constant 0 : index
    %c0_17 = arith.constant 0 : index
    %c0_18 = arith.constant 0 : index
    %22 = vector.load %arg7[%c0_16, %c0_17, %c0_18] : memref<2x128x8xf32, #tpu.memory_space<vmem>>, vector<1x128x8xf32>
    %23 = vector.shape_cast %22 : vector<1x128x8xf32> to vector<128x8xf32>
    %cst_19 = arith.constant dense<0.000000e+00> : vector<8x8xf32>
    %24 = tpu.matmul %20, %23, %cst_19 {dimension_numbers = #tpu.dot_dimension_numbers<[1], [0], [0], [1], [0, 0, 1, 1], [], []>} : vector<8x128xf32>, vector<128x8xf32>, vector<8x8xf32> -> vector<8x8xf32>
    %c0_20 = arith.constant 0 : index
    %c0_21 = arith.constant 0 : index
    %c0_22 = arith.constant 0 : index
    %25 = vector.load %arg8[%c0_20, %c0_21, %c0_22] : memref<2x1x8xf32, #tpu.memory_space<vmem>>, vector<1x1x8xf32>
    %26 = vector.shape_cast %25 : vector<1x1x8xf32> to vector<1x8xf32>
    %27 = vector.broadcast %26 : vector<1x8xf32> to vector<8x8xf32>
    %28 = arith.addf %24, %27 : vector<8x8xf32>
    %29 = arith.addf %28, %13 : vector<8x8xf32>
    %cst_23 = arith.constant dense<0xFF800000> : vector<8xf32>
    %30 = vector.multi_reduction <maximumf>, %29, %cst_23 [1] : vector<8x8xf32> to vector<8xf32>
    %31 = vector.shape_cast %30 : vector<8xf32> to vector<8x1xf32>
    %32 = vector.broadcast %31 : vector<8x1xf32> to vector<8x8xf32>
    %33 = arith.subf %29, %32 : vector<8x8xf32>
    %34 = math.exp %33 : vector<8x8xf32>
    %cst_24 = arith.constant dense<0.000000e+00> : vector<8xf32>
    %35 = vector.multi_reduction <add>, %34, %cst_24 [1] : vector<8x8xf32> to vector<8xf32>
    %36 = vector.shape_cast %35 : vector<8xf32> to vector<8x1xf32>
    %37 = tpu.reciprocal %36 {approx = true} : vector<8x1xf32> -> vector<8x1xf32>
    %38 = vector.broadcast %37 : vector<8x1xf32> to vector<8x8xf32>
    %39 = arith.mulf %34, %38 : vector<8x8xf32>
    %40 = arith.mulf %39, %9 : vector<8x8xf32>
    %c0_25 = arith.constant 0 : index
    %c0_26 = arith.constant 0 : index
    %c0_27 = arith.constant 0 : index
    %41 = vector.load %arg9[%c0_25, %c0_26, %c0_27] : memref<2x128x16xf32, #tpu.memory_space<vmem>>, vector<1x128x16xf32>
    %42 = vector.shape_cast %41 : vector<1x128x16xf32> to vector<128x16xf32>
    %cst_28 = arith.constant dense<0.000000e+00> : vector<8x16xf32>
    %43 = tpu.matmul %3, %42, %cst_28 {dimension_numbers = #tpu.dot_dimension_numbers<[1], [0], [0], [1], [0, 0, 1, 1], [], []>} : vector<8x128xf32>, vector<128x16xf32>, vector<8x16xf32> -> vector<8x16xf32>
    %c0_29 = arith.constant 0 : index
    %c0_30 = arith.constant 0 : index
    %c0_31 = arith.constant 0 : index
    %44 = vector.load %arg10[%c0_29, %c0_30, %c0_31] : memref<2x1x16xf32, #tpu.memory_space<vmem>>, vector<1x1x16xf32>
    %45 = vector.shape_cast %44 : vector<1x1x16xf32> to vector<1x16xf32>
    %46 = vector.broadcast %45 : vector<1x16xf32> to vector<8x16xf32>
    %47 = arith.addf %43, %46 : vector<8x16xf32>
    %cst_32 = arith.constant dense<0.000000e+00> : vector<8x16xf32>
    %48 = tpu.matmul %40, %47, %cst_32 {dimension_numbers = #tpu.dot_dimension_numbers<[1], [0], [0], [1], [0, 0, 1, 1], [], []>} : vector<8x8xf32>, vector<8x16xf32>, vector<8x16xf32> -> vector<8x16xf32>
    %c0_33 = arith.constant 0 : index
    %c0_34 = arith.constant 0 : index
    %c0_35 = arith.constant 0 : index
    %49 = vector.load %arg11[%c0_33, %c0_34, %c0_35] : memref<2x16x128xf32, #tpu.memory_space<vmem>>, vector<1x16x128xf32>
    %50 = vector.shape_cast %49 : vector<1x16x128xf32> to vector<16x128xf32>
    %cst_36 = arith.constant dense<0.000000e+00> : vector<8x128xf32>
    %51 = tpu.matmul %48, %50, %cst_36 {dimension_numbers = #tpu.dot_dimension_numbers<[1], [0], [0], [1], [0, 0, 1, 1], [], []>} : vector<8x16xf32>, vector<16x128xf32>, vector<8x128xf32> -> vector<8x128xf32>
    %52 = arith.addf %21, %51 : vector<8x128xf32>
    %c1 = arith.constant 1 : index
    %c0_37 = arith.constant 0 : index
    %c0_38 = arith.constant 0 : index
    %53 = vector.load %arg7[%c1, %c0_37, %c0_38] : memref<2x128x8xf32, #tpu.memory_space<vmem>>, vector<1x128x8xf32>
    %54 = vector.shape_cast %53 : vector<1x128x8xf32> to vector<128x8xf32>
    %cst_39 = arith.constant dense<0.000000e+00> : vector<8x8xf32>
    %55 = tpu.matmul %20, %54, %cst_39 {dimension_numbers = #tpu.dot_dimension_numbers<[1], [0], [0], [1], [0, 0, 1, 1], [], []>} : vector<8x128xf32>, vector<128x8xf32>, vector<8x8xf32> -> vector<8x8xf32>
    %c1_40 = arith.constant 1 : index
    %c0_41 = arith.constant 0 : index
    %c0_42 = arith.constant 0 : index
    %56 = vector.load %arg8[%c1_40, %c0_41, %c0_42] : memref<2x1x8xf32, #tpu.memory_space<vmem>>, vector<1x1x8xf32>
    %57 = vector.shape_cast %56 : vector<1x1x8xf32> to vector<1x8xf32>
    %58 = vector.broadcast %57 : vector<1x8xf32> to vector<8x8xf32>
    %59 = arith.addf %55, %58 : vector<8x8xf32>
    %60 = arith.addf %59, %13 : vector<8x8xf32>
    %cst_43 = arith.constant dense<0xFF800000> : vector<8xf32>
    %61 = vector.multi_reduction <maximumf>, %60, %cst_43 [1] : vector<8x8xf32> to vector<8xf32>
    %62 = vector.shape_cast %61 : vector<8xf32> to vector<8x1xf32>
    %63 = vector.broadcast %62 : vector<8x1xf32> to vector<8x8xf32>
    %64 = arith.subf %60, %63 : vector<8x8xf32>
    %65 = math.exp %64 : vector<8x8xf32>
    %cst_44 = arith.constant dense<0.000000e+00> : vector<8xf32>
    %66 = vector.multi_reduction <add>, %65, %cst_44 [1] : vector<8x8xf32> to vector<8xf32>
    %67 = vector.shape_cast %66 : vector<8xf32> to vector<8x1xf32>
    %68 = tpu.reciprocal %67 {approx = true} : vector<8x1xf32> -> vector<8x1xf32>
    %69 = vector.broadcast %68 : vector<8x1xf32> to vector<8x8xf32>
    %70 = arith.mulf %65, %69 : vector<8x8xf32>
    %71 = arith.mulf %70, %9 : vector<8x8xf32>
    %c1_45 = arith.constant 1 : index
    %c0_46 = arith.constant 0 : index
    %c0_47 = arith.constant 0 : index
    %72 = vector.load %arg9[%c1_45, %c0_46, %c0_47] : memref<2x128x16xf32, #tpu.memory_space<vmem>>, vector<1x128x16xf32>
    %73 = vector.shape_cast %72 : vector<1x128x16xf32> to vector<128x16xf32>
    %cst_48 = arith.constant dense<0.000000e+00> : vector<8x16xf32>
    %74 = tpu.matmul %3, %73, %cst_48 {dimension_numbers = #tpu.dot_dimension_numbers<[1], [0], [0], [1], [0, 0, 1, 1], [], []>} : vector<8x128xf32>, vector<128x16xf32>, vector<8x16xf32> -> vector<8x16xf32>
    %c1_49 = arith.constant 1 : index
    %c0_50 = arith.constant 0 : index
    %c0_51 = arith.constant 0 : index
    %75 = vector.load %arg10[%c1_49, %c0_50, %c0_51] : memref<2x1x16xf32, #tpu.memory_space<vmem>>, vector<1x1x16xf32>
    %76 = vector.shape_cast %75 : vector<1x1x16xf32> to vector<1x16xf32>
    %77 = vector.broadcast %76 : vector<1x16xf32> to vector<8x16xf32>
    %78 = arith.addf %74, %77 : vector<8x16xf32>
    %cst_52 = arith.constant dense<0.000000e+00> : vector<8x16xf32>
    %79 = tpu.matmul %71, %78, %cst_52 {dimension_numbers = #tpu.dot_dimension_numbers<[1], [0], [0], [1], [0, 0, 1, 1], [], []>} : vector<8x8xf32>, vector<8x16xf32>, vector<8x16xf32> -> vector<8x16xf32>
    %c1_53 = arith.constant 1 : index
    %c0_54 = arith.constant 0 : index
    %c0_55 = arith.constant 0 : index
    %80 = vector.load %arg11[%c1_53, %c0_54, %c0_55] : memref<2x16x128xf32, #tpu.memory_space<vmem>>, vector<1x16x128xf32>
    %81 = vector.shape_cast %80 : vector<1x16x128xf32> to vector<16x128xf32>
    %cst_56 = arith.constant dense<0.000000e+00> : vector<8x128xf32>
    %82 = tpu.matmul %79, %81, %cst_56 {dimension_numbers = #tpu.dot_dimension_numbers<[1], [0], [0], [1], [0, 0, 1, 1], [], []>} : vector<8x16xf32>, vector<16x128xf32>, vector<8x128xf32> -> vector<8x128xf32>
    %83 = arith.addf %52, %82 : vector<8x128xf32>
    %c0_57 = arith.constant 0 : index
    %c0_58 = arith.constant 0 : index
    %84 = vector.load %arg12[%c0_57, %c0_58] : memref<1x128xf32, #tpu.memory_space<vmem>>, vector<1x128xf32>
    %85 = vector.broadcast %84 : vector<1x128xf32> to vector<8x128xf32>
    %86 = arith.addf %83, %85 : vector<8x128xf32>
    %c0_59 = arith.constant 0 : index
    %c0_60 = arith.constant 0 : index
    %c0_61 = arith.constant 0 : index
    %87 = vector.load %arg13[%c0_59, %c0_60, %c0_61] : memref<1x8x128xf32, #tpu.memory_space<vmem>>, vector<1x8x128xf32>
    %88 = vector.shape_cast %87 : vector<1x8x128xf32> to vector<8x128xf32>
    %89 = vector.shape_cast %86 : vector<8x128xf32> to vector<1x8x128xf32>
    tpu.vector_store %arg13[%c0_59, %c0_60, %c0_61], %89 {strides = array<i32>} : memref<1x8x128xf32, #tpu.memory_space<vmem>>, vector<1x8x128xf32>,
    return
  }
  func.func @transform_0(%arg0: i32, %arg1: i32) -> (i32, i32, i32) {
    %c0_i32 = arith.constant 0 : i32
    %c0_i32_0 = arith.constant 0 : i32
    return %arg0, %arg1, %c0_i32 : i32, i32, i32
  }
  func.func @transform_1(%arg0: i32, %arg1: i32) -> (i32, i32, i32) {
    %c0_i32 = arith.constant 0 : i32
    %c0_i32_0 = arith.constant 0 : i32
    %c0_i32_1 = arith.constant 0 : i32
    return %arg0, %c0_i32, %c0_i32_0 : i32, i32, i32
  }
  func.func @transform_2(%arg0: i32, %arg1: i32) -> (i32, i32, i32) {
    %c0_i32 = arith.constant 0 : i32
    %c0_i32_0 = arith.constant 0 : i32
    return %arg0, %arg1, %c0_i32 : i32, i32, i32
  }
  func.func @transform_3(%arg0: i32, %arg1: i32) -> (i32, i32) {
    %c0_i32 = arith.constant 0 : i32
    %c0_i32_0 = arith.constant 0 : i32
    %c0_i32_1 = arith.constant 0 : i32
    return %c0_i32, %c0_i32_0 : i32, i32
  }
  func.func @transform_4(%arg0: i32, %arg1: i32) -> (i32, i32) {
    %c0_i32 = arith.constant 0 : i32
    %c0_i32_0 = arith.constant 0 : i32
    %c0_i32_1 = arith.constant 0 : i32
    return %c0_i32, %c0_i32_0 : i32, i32
  }
  func.func @transform_5(%arg0: i32, %arg1: i32) -> (i32, i32, i32) {
    %c0_i32 = arith.constant 0 : i32
    %c0_i32_0 = arith.constant 0 : i32
    %c0_i32_1 = arith.constant 0 : i32
    %c0_i32_2 = arith.constant 0 : i32
    return %c0_i32, %c0_i32_0, %c0_i32_1 : i32, i32, i32
  }
  func.func @transform_6(%arg0: i32, %arg1: i32) -> (i32, i32, i32) {
    %c0_i32 = arith.constant 0 : i32
    %c0_i32_0 = arith.constant 0 : i32
    %c0_i32_1 = arith.constant 0 : i32
    %c0_i32_2 = arith.constant 0 : i32
    return %c0_i32, %c0_i32_0, %c0_i32_1 : i32, i32, i32
  }
  func.func @transform_7(%arg0: i32, %arg1: i32) -> (i32, i32, i32) {
    %c0_i32 = arith.constant 0 : i32
    %c0_i32_0 = arith.constant 0 : i32
    %c0_i32_1 = arith.constant 0 : i32
    %c0_i32_2 = arith.constant 0 : i32
    return %c0_i32, %c0_i32_0, %c0_i32_1 : i32, i32, i32
  }
  func.func @transform_8(%arg0: i32, %arg1: i32) -> (i32, i32, i32) {
    %c0_i32 = arith.constant 0 : i32
    %c0_i32_0 = arith.constant 0 : i32
    %c0_i32_1 = arith.constant 0 : i32
    %c0_i32_2 = arith.constant 0 : i32
    return %c0_i32, %c0_i32_0, %c0_i32_1 : i32, i32, i32
  }
  func.func @transform_9(%arg0: i32, %arg1: i32) -> (i32, i32, i32) {
    %c0_i32 = arith.constant 0 : i32
    %c0_i32_0 = arith.constant 0 : i32
    %c0_i32_1 = arith.constant 0 : i32
    %c0_i32_2 = arith.constant 0 : i32
    return %c0_i32, %c0_i32_0, %c0_i32_1 : i32, i32, i32
  }
  func.func @transform_10(%arg0: i32, %arg1: i32) -> (i32, i32) {
    %c0_i32 = arith.constant 0 : i32
    %c0_i32_0 = arith.constant 0 : i32
    %c0_i32_1 = arith.constant 0 : i32
    return %c0_i32, %c0_i32_0 : i32, i32
  }
  func.func @transform_11(%arg0: i32, %arg1: i32) -> (i32, i32, i32) {
    %c0_i32 = arith.constant 0 : i32
    %c0_i32_0 = arith.constant 0 : i32
    return %arg0, %arg1, %c0_i32 : i32, i32, i32
  }
}

</mosaic_0001>

<bundles_post_ra>
// kernel: tpu_custom_call.1
= control target key start
LH: loop header
LB: loop body
LE: loop exit
PB: predicated region body
PF: predicated region fallthrough
CT: control target
= control target key end

     0   :  { %16 = vsyncpa [#allocation3], 0  ;;  %s1592_s0 = inlined_call_operand.vmem [shape: f32[2,8,128], index: 0, kind: input, shape index: {}]   ;;  %s1593_s1 = inlined_call_operand.vmem [shape: f32[2,8,128], index: 1, kind: input, shape index: {}]   ;;  %s1594_s2 = inlined_call_operand.vmem [shape: s8[2,8,8], index: 2, kind: input, shape index: {}]   ;;  %s1595_s3 = inlined_call_operand.vmem [shape: f32[128,128], index: 3, kind: input, shape index: {}]   ;;  %s1596_s4 = inlined_call_operand.vmem [shape: f32[1,128], index: 4, kind: input, shape index: {}]   ;;  %s1597_s5 = inlined_call_operand.vmem [shape: f32[2,128,8], index: 5, kind: input, shape index: {}]   ;;  %s1598_s6 = inlined_call_operand.vmem [shape: f32[2,1,8], index: 6, kind: input, shape index: {}]   ;;  %s1599_s7 = inlined_call_operand.vmem [shape: f32[2,128,16], index: 7, kind: input, shape index: {}]   ;;  %s1600_s8 = inlined_call_operand.vmem [shape: f32[2,1,16], index: 8, kind: input, shape index: {}]   ;;  %s1601_s9 = inlined_call_operand.vmem [shape: f32[2,16,128], index: 9, kind: input, shape index: {}]   ;;  %s1602_s10 = inlined_call_operand.vmem [shape: f32[1,128], index: 10, kind: input, shape index: {}]   ;;  %s1603_s11 = inlined_call_operand.hbm [shape: f32[2,8,128], index: 11, kind: output, shape index: {}]  }
   0x1   :  { %18 = vsyncpa [#allocation3 + $0x1], 0  ;;  %s1183_s17 = smov 0   ;;  %s1185_s18 = smov 0  }
   0x2   :  { %s1187_s19 = smov 0   ;;  %s1189_s20 = smov 0  }
   0x3   :  { %s1191_s21 = smov 0   ;;  %s1193_s22 = smov 0  }
   0x4 LB: > { %1608 = sst [smem:[#allocation5_spill]] %s1107_s19  ;;  %s916_s23 = sadd.s32 4294967295, %s1119_s22   ;;  %s1119_s22 = sphi %s1193_s22, %s24_s22   ;;  %s1115_s21 = sphi %s1191_s21, %s1618_s21   ;;  %s1111_s20 = sphi %s1189_s20, %s1617_s20   ;;  %s1107_s19 = sphi %s1187_s19, %s1616_s19   ;;  %s1103_s18 = sphi %s1185_s18, %s1620_s18   ;;  %s1099_s17 = sphi %s1183_s17, %s1619_s17  }
   0x5   : > { %1609 = sst [smem:[#allocation6_spill]] %s1115_s21  ;;  %s917_s24 = sadd.s32 4294967294, %s1119_s22  }
   0x6   : > { %s36_s25 = sadd.s32 1, %s1115_s21  ;;  %s295_s26 = sadd.s32 1, %s1107_s19 }
   0x7   : > { %p38_p0 = scmp.ge.s32.totalorder %s36_s25, 2  ;;  %p305_p1 = scmp.ne.s32.totalorder %s1107_s19, %s1103_s18 }
   0x8   : > { %p306_p2 = scmp.eq.s32.totalorder %s916_s23, 1  ;;  %p311_p3 = scmp.ne.s32.totalorder %s1103_s18, %s1099_s17 }
   0x9   : > { %s1622_s25 = smov (%p38_p0, %s36_s25), 0  ;;  %p312_p5 = scmp.eq.s32.totalorder %s917_s24, 1 }
   0xa   : > { %1610 = sst [smem:[#allocation7_spill]] %s1622_s25  ;;  %p1223_p4 = por %p306_p2, %p305_p1 }
   0xb   : > { %s290_s28 = ssub.s32 %s1115_s21, %s1622_s25  ;;  %p920_p6 = scmp.ge.s32.totalorder %s1119_s22, 1 }
   0xc   : > { %p293_p7 = scmp.eq.s32.totalorder %s290_s28, 0  ;;  %p1230_p8 = por %p312_p5, %p311_p3 }
   0xd   : > { %p381_p9 = scmp.lt.s32.totalorder %s1119_s22, 3 }
   0xe   : > { %s1236_s30 = scalar_select %p293_p7, %s1107_s19, %s295_s26  }
   0xf   : > { %p382_p10 = pnand %p920_p6, %p381_p9 }
  0x10   : > { %1613 = sst [smem:[#allocation8_spill]] %s1236_s30  ;;  %p434_p11 = scmp.lt.s32.totalorder (!%p382_p10), %s1111_s20, 1 }
  0x11   : > { %385 = sbr.rel (%p382_p10) target bundleno = 1235 (0x4d3), region = 64  ;;  %s967_s16 = sshll.u32 (!%p382_p10), %s1111_s20, 3 }
  0x12   : > { %s813_s24 = scalar_lea.hbm (!%p382_p10), %s1603_s11, %s967_s16  ;;  %s1061_s19 = scalar_lea.hbm (!%p382_p10), %s1603_s11, 16 }
  0x16   : > { %v480_v0 = vld [vmem:[%s1595_s3 + $0x78] sm:$0xff]  ;;  %v479_v1 = vld [vmem:[%s1595_s3 + $0x70] sm:$0xff]  ;;  %v478_v2 = vld [vmem:[%s1595_s3 + $0x68] sm:$0xff]  ;;  %s1297_s25 = scalar_select %p434_p11, %s1111_s20, 1  ;;  %v1121_v43 = vmov 0   ;;  %v1122_v51 = vmov 0.0  }
  0x17   : > { %485 = vmatpush.msra.mxu0 %v480_v0  ;;  %v477_v3 = vld [vmem:[%s1595_s3 + $0x60] sm:$0xff]  ;;  %v521_v4 = vld [vmem:[%s1597_s5 + $0x78] sm:$0xff]  ;;  %v520_v5 = vld [vmem:[%s1597_s5 + $0x70] sm:$0xff]  ;;  %vm547_vm2 = vcmask 64512   ;;  %vm748_vm3 = vcmask 130048  }
  0x18   : > { %v476_v6 = vld [vmem:[%s1595_s3 + $0x58] sm:$0xff]  ;;  %526 = vmatpush.msra.mxu1 %v521_v4  ;;  %v519_v7 = vld [vmem:[%s1597_s5 + $0x68] sm:$0xff]  ;;  %v475_v8 = vld [vmem:[%s1595_s3 + $0x50] sm:$0xff]  ;;  %s1607_s28 = sshll.u32 %s1297_s25, 3  ;;  %s924_s12 = sshll.u32 %s1297_s25, 1 }
  0x19   : > { %486 = vmatpush.msra.mxu0 %v479_v1  ;;  %v518_v9 = vld [vmem:[%s1597_s5 + $0x60] sm:$0xff]  ;;  %v474_v10 = vld [vmem:[%s1595_s3 + $0x48] sm:$0xff]  ;;  %v517_v11 = vld [vmem:[%s1597_s5 + $0x58] sm:$0xff]  ;;  %s440_s26 = scalar_lea.vmem %s1592_s0, %s1607_s28  ;;  %s451_s14 = scalar_lea.vmem %s1594_s2, %s924_s12 }
  0x1a   : > { %527 = vmatpush.msra.mxu1 %v520_v5  ;;  %v473_v12 = vld [vmem:[%s1595_s3 + $0x40] sm:$0xff]  ;;  %v516_v13 = vld [vmem:[%s1597_s5 + $0x50] sm:$0xff]  ;;  %v472_v14 = vld [vmem:[%s1595_s3 + $0x38] sm:$0xff]  ;;  %s1614_s12 = sshll.u32 %s1297_s25, 3  ;;  %s431_s25 = sand.u32 1, %s1103_s18  }
  0x1b   : > { %487 = vmatpush.msra.mxu0 %v478_v2  ;;  %v515_v15 = vld [vmem:[%s1597_s5 + $0x48] sm:$0xff]  ;;  %v471_v16 = vld [vmem:[%s1595_s3 + $0x30] sm:$0xff]  ;;  %v514_v17 = vld [vmem:[%s1597_s5 + $0x40] sm:$0xff]  ;;  %s921_s28 = sshll.u32 %s431_s25, 3  ;;  %s802_s20 = scalar_lea.sflag [#allocation3], %s431_s25 }
  0x1c   : > { %528 = vmatpush.msra.mxu1 %v519_v7  ;;  %v470_v18 = vld [vmem:[%s1595_s3 + $0x28] sm:$0xff]  ;;  %v513_v19 = vld [vmem:[%s1597_s5 + $0x38] sm:$0xff]  ;;  %v469_v20 = vld [vmem:[%s1595_s3 + $0x20] sm:$0xff]  ;;  %s433_s21 = scalar_lea.vmem [#allocation2], %s921_s28 }
  0x1d   : > { %488 = vmatpush.msra.mxu0 %v477_v3  ;;  %v512_v21 = vld [vmem:[%s1597_s5 + $0x30] sm:$0xff]  ;;  %v468_v22 = vld [vmem:[%s1595_s3 + $0x18] sm:$0xff]  ;;  %v511_v23 = vld [vmem:[%s1597_s5 + $0x28] sm:$0xff]  ;;  %s815_s13 = sshll.u32 %s433_s21, 4  ;;  %s816_s13 = int_to_ptr.vmem [resolvable:$true] %s815_s13 }
  0x1e   : > { %529 = vmatpush.msra.mxu1 %v518_v9  ;;  %v467_v24 = vld [vmem:[%s1595_s3 + $0x10] sm:$0xff]  ;;  %v510_v25 = vld [vmem:[%s1597_s5 + $0x20] sm:$0xff]  ;;  %v466_v26 = vld [vmem:[%s1595_s3 + $0x8] sm:$0xff] }
  0x1f   : > { %489 = vmatpush.msra.mxu0 %v476_v6  ;;  %v509_v27 = vld [vmem:[%s1597_s5 + $0x18] sm:$0xff]  ;;  %v465_v28 = vld [vmem:[%s1595_s3] sm:$0xff]  ;;  %v508_v30 = vld [vmem:[%s1597_s5 + $0x10] sm:$0xff] }
  0x20   : > { %530 = vmatpush.msra.mxu1 %v517_v11  ;;  %v454_v29 = vld [vmem:[%s440_s26] sm:$0xff]  ;;  %v507_v31 = vld [vmem:[%s1597_s5 + $0x8] sm:$0xff]  ;;  %v575_v37 = vld [vmem:[%s1599_s7 + $0x78] sm:$0xff] }
  0x21   : > { %490 = vmatpush.msra.mxu0 %v475_v8  ;;  %v506_v32 = vld [vmem:[%s1597_s5] sm:$0xff]  ;;  %v574_v38 = vld [vmem:[%s1599_s7 + $0x70] sm:$0xff]  ;;  %580 = vmatpush.msra.mxu2 %v575_v37  ;;  %v573_v40 = vld [vmem:[%s1599_s7 + $0x68] sm:$0xff] }
  0x22   : > { %531 = vmatpush.msra.mxu1 %v516_v13  ;;  %v1027_v33 = vld [vmem:[%s1596_s4] ss:$0 sm:$0xff]  ;;  %v571_v42 = vld [vmem:[%s1599_s7 + $0x58] sm:$0xff]  ;;  %v570_v45 = vld [vmem:[%s1599_s7 + $0x50] sm:$0xff] }
  0x23   : > { %491 = vmatpush.msra.mxu0 %v474_v10  ;;  %v456_v39 = vld [vmem:[%s451_s14] sm:$0x3]  ;;  %581 = vmatpush.msra.mxu2 %v574_v38  ;;  %v569_v46 = vld [vmem:[%s1599_s7 + $0x48] sm:$0xff]  ;;  %v567_v49 = vld [vmem:[%s1599_s7 + $0x38] sm:$0xff]  ;;  %s444_s14 = scalar_lea.vmem %s1593_s1, %s1614_s12 }
  0x24   : > { %532 = vmatpush.msra.mxu1 %v515_v15  ;;  %v572_v41 = vld [vmem:[%s1599_s7 + $0x60] sm:$0xff]  ;;  %vm457_vm0 = vnez %v456_v39  ;;  %v566_v50 = vld [vmem:[%s1599_s7 + $0x30] sm:$0xff]  ;;  %v565_v53 = vld [vmem:[%s1599_s7 + $0x28] sm:$0xff] }
  0x25   : > { %492 = vmatpush.msra.mxu0 %v473_v12  ;;  %582 = vmatpush.msra.mxu2 %v573_v40  ;;  %v458_v44 = vsel %vm457_vm0, 16843009, %v1121_v43  ;;  %v568_v48 = vld [vmem:[%s1599_s7 + $0x40] sm:$0xff]  ;;  %v563_v56 = vld [vmem:[%s1599_s7 + $0x18] sm:$0xff]  ;;  %v562_v58 = vld [vmem:[%s1599_s7 + $0x10] sm:$0xff] }
  0x26   : > { %533 = vmatpush.msra.mxu1 %v514_v17  ;;  %v459_v47 = vunpack.c.0.s8 %v458_v44  ;;  %v564_v54 = vld [vmem:[%s1599_s7 + $0x20] sm:$0xff]  ;;  %v561_v61 = vld [vmem:[%s1599_s7 + $0x8] sm:$0xff]  ;;  %v942_v11 = vld [vmem:[%s1597_s5 + $0xf8] sm:$0xff] }
  0x27   : > { %493 = vmatpush.msra.mxu0 %v472_v14  ;;  %583 = vmatpush.msra.mxu2 %v572_v41  ;;  %v1028_v57 = vld [vmem:[%s1598_s6] ss:$0 sm:$0xff]  ;;  %v941_v12 = vld [vmem:[%s1597_s5 + $0xf0] sm:$0xff]  ;;  %v940_v13 = vld [vmem:[%s1597_s5 + $0xe8] sm:$0xff] }
  0x28   : > { %534 = vmatpush.msra.mxu1 %v513_v19  ;;  %vm460_vm1 = vcmp.ne.s32.totalorder %v459_v47, 0  ;;  %v560_v63 = vld [vmem:[%s1599_s7] sm:$0xff]  ;;  %v938_v15 = vld [vmem:[%s1597_s5 + $0xd8] sm:$0xff]  ;;  %v936_v17 = vld [vmem:[%s1597_s5 + $0xc8] sm:$0xff] }
  0x29   : > { %494 = vmatpush.msra.mxu0 %v471_v16  ;;  %584 = vmatpush.msra.mxu2 %v571_v42  ;;  %v1386_v52 = vsel %vm460_vm1, 1.0, %v1122_v51  ;;  %v1418_v1 = vld [vmem:[%s444_s14] sm:$0xff]  ;;  %v937_v16 = vld [vmem:[%s1597_s5 + $0xd0] sm:$0xff]  ;;  %v934_v19 = vld [vmem:[%s1597_s5 + $0xb8] sm:$0xff]  ;;  %s817_s14 = sshll.u32 %s813_s24, 4  ;;  %s818_s14 = int_to_ptr.hbm [resolvable:$true] %s817_s14 }
  0x2a   : > { %535 = vmatpush.msra.mxu1 %v512_v21  ;;  %v463_v55 = vsub.f32 1.0, %v1386_v52  ;;  %v1029_v8 = vld [vmem:[%s1600_s8] ss:$0 sm:$0xff]  ;;  %v932_v21 = vld [vmem:[%s1597_s5 + $0xa8] sm:$0xff]  ;;  %v954_v38 = vld [vmem:[%s1599_s7 + $0xd0] sm:$0xff]  ;;  %s1055_s30 = sshra.s32 %s818_s14, 4  ;;  %s1056_s30 = int_to_ptr.hbm [resolvable:$true] %s1055_s30 }
  0x2b   : > { %495 = vmatpush.msra.mxu0 %v470_v18  ;;  %585 = vmatpush.msra.mxu2 %v570_v45  ;;  %v939_v14 = vld [vmem:[%s1597_s5 + $0xe0] sm:$0xff]  ;;  %v957_v37 = vld [vmem:[%s1599_s7 + $0xe8] sm:$0xff]  ;;  %v951_v41 = vld [vmem:[%s1599_s7 + $0xb8] sm:$0xff]  ;;  %s1057_s15 = scalar_lea.hbm %s1056_s30, 8  ;;  %p1062_p1 = scmp.lt.s32.totalorder %s1056_s30, %s1603_s11 }
  0x2c   : > { %536 = vmatpush.msra.mxu1 %v511_v23  ;;  %v1404_v59 = vmul.f32 -3.4028235e+38, %v463_v55  ;;  %v935_v18 = vld [vmem:[%s1597_s5 + $0xc0] sm:$0xff]  ;;  %v930_v23 = vld [vmem:[%s1597_s5 + $0x98] sm:$0xff]  ;;  %v953_v39 = vld [vmem:[%s1599_s7 + $0xc8] sm:$0xff]  ;;  %p1058_p12 = scmp.ne.s32.totalorder %s1056_s30, %s1057_s15  ;;  %p1063_p2 = scmp.lt.s32.totalorder %s1061_s19, %s1057_s15 }
  0x2d   : > { %496 = vmatpush.msra.mxu0 %v469_v20  ;;  %586 = vmatpush.msra.mxu2 %v569_v46  ;;  %v933_v20 = vld [vmem:[%s1597_s5 + $0xb0] sm:$0xff]  ;;  %v952_v40 = vld [vmem:[%s1599_s7 + $0xc0] sm:$0xff]  ;;  %v949_v44 = vld [vmem:[%s1599_s7 + $0xa8] sm:$0xff] }
  0x2e   : > { %537 = vmatpush.msra.mxu1 %v510_v25  ;;  %v928_v25 = vld [vmem:[%s1597_s5 + $0x88] sm:$0xff]  ;;  %v950_v42 = vld [vmem:[%s1599_s7 + $0xb0] sm:$0xff]  ;;  %v948_v45 = vld [vmem:[%s1599_s7 + $0xa0] sm:$0xff]  ;;  %p1059_p13 = pnand %p1058_p12, %p1223_p4  ;;  %p1064_p3 = por %p1063_p2, %p1062_p1 }
  0x2f   : > { %497 = vmatpush.msra.mxu0 %v468_v22  ;;  %587 = vmatpush.msra.mxu2 %v568_v48  ;;  %v931_v22 = vld [vmem:[%s1597_s5 + $0xa0] sm:$0xff]  ;;  %v947_v46 = vld [vmem:[%s1599_s7 + $0x98] sm:$0xff]  ;;  %v946_v48 = vld [vmem:[%s1599_s7 + $0x90] sm:$0xff] }
  0x30   : > { %538 = vmatpush.msra.mxu1 %v509_v27  ;;  %v1030_v47 = vld [vmem:[%s1598_s6 + $0x1] ss:$0 sm:$0xff]  ;;  %p1060_p0 = pneg %p1059_p13 }
  0x31   : > { %498 = vmatpush.msra.mxu0 %v467_v24  ;;  %588 = vmatpush.msra.mxu2 %v567_v49  ;;  %v929_v24 = vld [vmem:[%s1597_s5 + $0x90] sm:$0xff]  ;;  %v944_v55 = vld [vmem:[%s1599_s7 + $0x80] sm:$0xff] }
  0x32   : > { %539 = vmatpush.msra.mxu1 %v508_v30  ;;  %p1065_p5 = pnand %p1064_p3, %p1060_p0 }
  0x33   : > { %499 = vmatpush.msra.mxu0 %v466_v26  ;;  %589 = vmatpush.msra.mxu2 %v566_v50  ;;  %v927_v26 = vld [vmem:[%s1597_s5 + $0x80] sm:$0xff] }
  0x34   : > { %540 = vmatpush.msra.mxu1 %v507_v31  ;;  %v624_v31 = vld [vmem:[%s1601_s9 + $0x8] sm:$0xff] }
  0x35   : > { %500 = vmatpush.msra.mxu0 %v465_v28  ;;  %590 = vmatpush.msra.mxu2 %v565_v53 }
  0x36   : > { %501 = vmatmul.f32.vlgmr.msra.gmra.mxu0 %v454_v29  ;;  %541 = vmatpush.msra.mxu1 %v506_v32  ;;  %v623_v32 = vld [vmem:[%s1601_s9] sm:$0xff] }
  0x37   : > { %591 = vmatpush.msra.mxu2 %v564_v54  ;;  %v945_v54 = vld [vmem:[%s1599_s7 + $0x88] sm:$0xff] }
  0x39   : > { %592 = vmatpush.msra.mxu2 %v563_v56 }
  0x3b   : > { %593 = vmatpush.msra.mxu2 %v562_v58 }
  0x3d   : > { %594 = vmatpush.msra.mxu2 %v561_v61  ;;  %v1031_v61 = vld [vmem:[%s1600_s8 + $0x1] ss:$0 sm:$0xff] }
  0x3f   : > { %595 = vmatpush.msra.mxu2 %v560_v63 }
  0x40   : > { %596 = vmatmul.f32.vlgmr.msra.gmra.mxu2 %v1418_v1 }
  0xb3   : > { %v502_v34 = vpop.f32.mrf.mxu0 }
  0xb4   : > { %v1347_v35 = vadd.f32 %v1027_v33, %v502_v34  ;;  %v959_v33 = vld [vmem:[%s1599_s7 + $0xf8] sm:$0xff]  ;;  %v958_v34 = vld [vmem:[%s1599_s7 + $0xf0] sm:$0xff] }
  0xb5   : > { %702 = vmatpush.msrb.mxu0 %v959_v33 }
  0xb6   : > { %v505_v36 = vmax.f32 %v1347_v35, 0.0  ;;  %v956_v35 = vld [vmem:[%s1599_s7 + $0xe0] sm:$0xff] }
  0xb7   : > { %703 = vmatpush.msrb.mxu0 %v958_v34 }
  0xb8   : > { %542 = vmatmul.f32.vlgmr.msra.gmra.mxu1 %v505_v36 }
  0xb9   : > { %704 = vmatpush.msrb.mxu0 %v957_v37 }
  0xbb   : > { %705 = vmatpush.msrb.mxu0 %v956_v35 }
  0xc3   : > { %v597_v9 = vpop.f32.mrf.mxu2 }
  0xc4   : > { %v598_v10 = vadd.f32 %v1029_v8, %v597_v9 }
  0xc6   : > { %618 = vmatpush.msra.mxu3 %v598_v10 }
  0xc8   : > { %647 = vmatpush.msrb.mxu3 %v942_v11 }
  0xca   : > { %648 = vmatpush.msrb.mxu3 %v941_v12 }
  0xcc   : > { %649 = vmatpush.msrb.mxu3 %v940_v13 }
  0xce   : > { %650 = vmatpush.msrb.mxu3 %v939_v14 }
  0xd0   : > { %651 = vmatpush.msrb.mxu3 %v938_v15 }
  0xd2   : > { %652 = vmatpush.msrb.mxu3 %v937_v16 }
  0xd4   : > { %653 = vmatpush.msrb.mxu3 %v936_v17 }
  0xd6   : > { %654 = vmatpush.msrb.mxu3 %v935_v18 }
  0xd8   : > { %655 = vmatpush.msrb.mxu3 %v934_v19 }
  0xda   : > { %656 = vmatpush.msrb.mxu3 %v933_v20 }
  0xdc   : > { %657 = vmatpush.msrb.mxu3 %v932_v21 }
  0xde   : > { %658 = vmatpush.msrb.mxu3 %v931_v22 }
  0xe0   : > { %659 = vmatpush.msrb.mxu3 %v930_v23 }
  0xe2   : > { %660 = vmatpush.msrb.mxu3 %v929_v24 }
  0xe4   : > { %661 = vmatpush.msrb.mxu3 %v928_v25 }
  0xe6   : > { %662 = vmatpush.msrb.mxu3 %v927_v26 }
 0x135   : > { %v543_v60 = vpop.f32.mrf.mxu1 }
 0x136   : > { %v544_v62 = vadd.f32 %v1028_v57, %v543_v60 }
 0x138   : > { %v546_v0 = vadd.f32 %v544_v62, %v1404_v59 }
 0x13a   : > { %v548_v2 = vsel %vm547_vm2, %v546_v0, -inf }
 0x13b   : > { %549 = vmax.xlane.f32.xlu0 %v548_v2 }
 0x1ae   : > { %v550_v3 = vpop.xlane.xlu0 %549 }
 0x1af   : > { %v551_v4 = vsub.f32 %v546_v0, %v550_v3  ;;  %v963_v0 = vld [vmem:[%s1601_s9 + $0x18] sm:$0xff] }
 0x1b0   : > { %766 = vmatpush.msrb.mxu2 %v963_v0 }
 0x1b1   : > { %v552_v5 = vmul.f32 1.442695, %v551_v4 }
 0x1b3   : > { %1033 = vpow2.f32 %v552_v5 }
 0x1b9   : > { %v1034_v6 = vpop.eup %1033 }
 0x1ba   : > { %v554_v7 = vsel %vm547_vm2, %v1034_v6, 0.0 }
 0x1bb   : > { %555 = vadd.xlane.f32.xlu0 %v554_v7  ;;  %v1032_v7 = vld [vmem:[%s1602_s10] ss:$0 sm:$0xff] }
 0x22e   : > { %v556_v27 = vpop.xlane.xlu0 %555 }
 0x22f   : > { %1035 = vrcp.f32 %v556_v27 }
 0x235   : > { %v1036_v28 = vpop.eup %1035 }
 0x236   : > { %v558_v29 = vmul.f32 %v1036_v28, %v1034_v6 }
 0x238   : > { %v559_v30 = vmul.f32 %v1386_v52, %v558_v29 }
 0x23a   : > { %926 = vmatmul.msk.f32.vlgmr.msra.gmra.mxu3 %vm547_vm2, %v559_v30 }
 0x23b   : > { %789 = vmatpush.msra.mxu3 %v624_v31 }
 0x23d   : > { %790 = vmatpush.msra.mxu3 %v623_v32 }
 0x242   : > { %663 = vmatmul.f32.vlgmr.msrb.gmra.mxu3 %v505_v36  ;;  %v955_v36 = vld [vmem:[%s1599_s7 + $0xd8] sm:$0xff] }
 0x243   : > { %706 = vmatpush.msrb.mxu0 %v955_v36 }
 0x245   : > { %707 = vmatpush.msrb.mxu0 %v954_v38 }
 0x247   : > { %708 = vmatpush.msrb.mxu0 %v953_v39 }
 0x249   : > { %709 = vmatpush.msrb.mxu0 %v952_v40 }
 0x24b   : > { %710 = vmatpush.msrb.mxu0 %v951_v41 }
 0x24d   : > { %711 = vmatpush.msrb.mxu0 %v950_v42 }
 0x24f   : > { %712 = vmatpush.msrb.mxu0 %v949_v44 }
 0x251   : > { %713 = vmatpush.msrb.mxu0 %v948_v45 }
 0x253   : > { %714 = vmatpush.msrb.mxu0 %v947_v46 }
 0x255   : > { %715 = vmatpush.msrb.mxu0 %v946_v48 }
 0x257   : > { %716 = vmatpush.msrb.mxu0 %v945_v54 }
 0x259   : > { %717 = vmatpush.msrb.mxu0 %v944_v55 }
 0x25a   : > { %718 = vmatmul.f32.vlgmr.msrb.gmra.mxu0 %v1418_v1  ;;  %v962_v1 = vld [vmem:[%s1601_s9 + $0x10] sm:$0xff] }
 0x25b   : > { %767 = vmatpush.msrb.mxu2 %v962_v1 }
 0x2bd   : > { %v620_v43 = vpop.f32.mrf.mxu3 }
 0x2be   : > { %965 = vmatmul.msk.f32.vlgmr.msra.gmra.mxu3 %vm748_vm3, %v620_v43 }
 0x2c5   : > { %v664_v49 = vpop.f32.mrf.mxu3 }
 0x2c6   : > { %v665_v50 = vadd.f32 %v1030_v47, %v664_v49 }
 0x2c8   : > { %v667_v51 = vadd.f32 %v665_v50, %v1404_v59 }
 0x2ca   : > { %v668_v53 = vsel %vm547_vm2, %v667_v51, -inf }
 0x2cb   : > { %669 = vmax.xlane.f32.xlu1 %v668_v53 }
 0x2d7   : > { %v719_v62 = vpop.f32.mrf.mxu0 }
 0x2d8   : > { %v720_v63 = vadd.f32 %v1031_v61, %v719_v62 }
 0x2da   : > { %740 = vmatpush.msrb.mxu1 %v720_v63 }
 0x33e   : > { %v670_v56 = vpop.xlane.xlu1 %669 }
 0x33f   : > { %v671_v57 = vsub.f32 %v667_v51, %v670_v56 }
 0x341   : > { %v672_v58 = vmul.f32 1.442695, %v671_v57  ;;  %v792_v8 = vpop.f32.mrf.mxu3 }
 0x343   : > { %1037 = vpow2.f32 %v672_v58 }
 0x349   : > { %v1038_v59 = vpop.eup %1037 }
 0x34a   : > { %v674_v60 = vsel %vm547_vm2, %v1038_v59, 0.0 }
 0x34b   : > { %675 = vadd.xlane.f32.xlu1 %v674_v60 }
 0x3be   : > { %v676_v2 = vpop.xlane.xlu1 %675 }
 0x3bf   : > { %1039 = vrcp.f32 %v676_v2 }
 0x3c5   : > { %v1040_v3 = vpop.eup %1039 }
 0x3c6   : > { %v678_v4 = vmul.f32 %v1040_v3, %v1038_v59 }
 0x3c8   : > { %v679_v5 = vmul.f32 %v1386_v52, %v678_v4 }
 0x3ca   : > { %961 = vmatmul.msk.f32.vlgmr.msrb.gmra.mxu1 %vm547_vm2, %v679_v5 }
 0x447   : > { %v742_v6 = vpop.f32.mrf.mxu1 }
 0x448   : > { %964 = vmatmul.msk.f32.vlgmr.msrb.gmra.mxu2 %vm748_vm3, %v742_v6 }
 0x4cb   : > { %v769_v9 = vpop.f32.mrf.mxu2 }
 0x4cc   : > { %v793_v52 = vadd.f32 %v792_v8, %v769_v9 }
 0x4ce   : > { %v799_v10 = vadd.f32 %v1032_v7, %v793_v52 }
 0x4d0   : > { %800 = vst [vmem:[%s433_s21] sm:$0xff] %v799_v10 }
 0x4d1   : > { %1068 = shalt.err (!%p1065_p5)
}
 0x4d2   : > { %970 = dma.vmem_to_hbm [thread:$0]  (%p1223_p4), %s816_s13, 128, %s818_s14, %s802_s20  }
 0x4d3 PF: > { %p976_p6 = scmp.ge.s32.totalorder %s1119_s22, 2  ;;  %s829_s25 = sand.u32 1, %s1099_s17  }
 0x4d4   : > { %s830_s24 = scalar_lea.sflag [#allocation3], %s829_s25 }
 0x4d5   : > { %p973_p7 = pnand %p976_p6, %p1230_p8 }
 0x4d7   : > { %p974_p9 = pneg %p973_p7 }
 0x4d9   : > { %1094 = dma.done.wait (%p974_p9), %s830_s24, 128  }
 0x4da   : > { %1096 = vsyncadd (%p974_p9), %s830_s24, 4294967168  ;;  %s24_s22 = sadd.s32 1, %s1119_s22   ;;  %s1615_s12 = sld [smem:[#allocation5_spill]] }
 0x4db   : > { %p21_p10 = scmp.ge.s32.totalorder %s24_s22, 4   ;;  %s1616_s19 = sld [smem:[#allocation8_spill]] }
 0x4dc   : > { %s1617_s20 = sld [smem:[#allocation6_spill]]  ;;  %s1619_s17 = smov %s1103_s18 }
 0x4dd   : > { %s1618_s21 = sld [smem:[#allocation7_spill]]  ;;  %23 = sbr.rel (!%p21_p10) target bundleno = 4 (0x4), region = 110 }
 0x4e0   : > { %s1620_s18 = smov %s1615_s12 }
 0x4e2   :  { %836 = vsyncpa [#allocation3], 1 }
 0x4e3   :  { %838 = vsyncpa [#allocation3 + $0x1], 1 }

</bundles_post_ra>
